<compile_context>
chip_gen: v7x
topology: tpu7x:2x2x1
jax: 0.10.0
libtpu: 0.0.40
codegen_flags: <defaults>
</compile_context>

<pallas_src>
import functools

import jax
import jax.numpy as jnp
from jax.experimental import pallas as pl
from jax.experimental.pallas import tpu as pltpu


LANES = 128  # TPU lane width; pad output features to a multiple of this.


def _round_up(n: int, m: int) -> int:
    return ((n + m - 1) // m) * m


# Activations supported by the gensit config (subset actually used by the module's
# hyperparameter search space). All are elementwise -> VPU/EUP, free alongside MXU.
_ACTIVATIONS = {
    "linear": lambda x: x,
    "abs": jnp.abs,
    "relu": lambda x: jnp.maximum(x, 0.0),
    "tanh": jnp.tanh,
    "hardsigmoid": lambda x: jnp.clip(x / 6.0 + 0.5, 0.0, 1.0),
}


def _fused_linear_act_kernel(x_ref, w_ref, b_ref, o_ref, *, act):
    """act(x @ W + b) for one batch tile (layers pre-fused in the wrapper).

    x_ref: (TB, in)      -- batch tile
    w_ref: (in, out_pad) -- fused weight, lane-padded, grid-invariant (stays in VMEM)
    b_ref: (1, out_pad)  -- fused bias, lane-padded, grid-invariant
    o_ref: (TB, out_pad)
    """
    y = jnp.dot(x_ref[...], w_ref[...], preferred_element_type=jnp.float32)
    o_ref[...] = act(y + b_ref[...]).astype(o_ref.dtype)


def _two_layer_kernel(x_ref, w0_ref, b0_ref, w1_ref, b1_ref, o_ref, *, act0, act1):
    """act1(act0(x @ W0 + b0) @ W1 + b1) for one batch tile.

    The hidden activations never leave VMEM. Used only when the layer-0 activation
    is not the identity (so algebraic fusion is not valid).
    """
    h = jnp.dot(x_ref[...], w0_ref[...], preferred_element_type=jnp.float32)
    h = act0(h + b0_ref[...])
    y = jnp.dot(h, w1_ref[...], preferred_element_type=jnp.float32)
    o_ref[...] = act1(y + b1_ref[...]).astype(o_ref.dtype)


def _batch_tiling(B: int, block_batch: int):
    """Pick a batch tile (multiple of 8 sublanes) and padded batch extent."""
    tb = min(_round_up(max(block_batch, 8), 8), _round_up(B, 8))
    b_padded = _round_up(B, tb)
    return tb, b_padded


def neuralnet_forward(x, w0, b0, w1, b1, *, block_batch: int = 2048,
                      activations=("linear", "abs")):
    """Forward pass of the 2-layer NeuralNet.

    x: (B, in), w0: (in, hidden), b0: (1, hidden), w1: (hidden, out), b1: (1, out).
    Weights are stored as (in_features, out_features), so the kernel computes
    x @ W (== torch's x @ W.T). Returns (B, out) float32.

    activations: (layer0_activation, layer1_activation) names; DEFAULT_HYPERPARAMS
    gives ('linear', 'abs').
    """
    act0_name, act1_name = activations
    act0 = _ACTIVATIONS[act0_name]
    act1 = _ACTIVATIONS[act1_name]

    B, in_dim = x.shape
    out_dim = w1.shape[1]
    out_pad = _round_up(max(out_dim, 1), LANES)

    tb, b_padded = _batch_tiling(B, block_batch)
    x_p = jnp.pad(x.astype(jnp.float32), ((0, b_padded - B), (0, 0)))
    grid = (b_padded // tb,)
    compiler_params = pltpu.CompilerParams(
        dimension_semantics=("parallel",),  # shard batch tiles across TCs (v7x)
    )

    if act0_name == "linear":
        # Algebraic layer fusion (exact: layer-0 activation is identity). Tiny,
        # loop-invariant work done once in plain XLA.
        w_fused = (w0 @ w1).astype(jnp.float32)          # (in, out)
        b_fused = (b0 @ w1 + b1).astype(jnp.float32)     # (1, out)
        w_p = jnp.pad(w_fused, ((0, 0), (0, out_pad - out_dim)))
        b_p = jnp.pad(b_fused, ((0, 0), (0, out_pad - out_dim)))

        out_p = pl.pallas_call(
            functools.partial(_fused_linear_act_kernel, act=act1),
            out_shape=jax.ShapeDtypeStruct((b_padded, out_pad), jnp.float32),
            grid=grid,
            in_specs=[
                pl.BlockSpec((tb, in_dim), lambda i: (i, 0)),       # x: tiled over batch
                pl.BlockSpec((in_dim, out_pad), lambda i: (0, 0)),  # fused weight: resident
                pl.BlockSpec((1, out_pad), lambda i: (0, 0)),       # fused bias: resident
            ],
            out_specs=pl.BlockSpec((tb, out_pad), lambda i: (i, 0)),
            compiler_params=compiler_params,
        )(x_p, w_p, b_p)
    else:
        # General path: both matmuls inside one kernel; hidden activations stay on-chip.
        hidden = w0.shape[1]
        w0_p = w0.astype(jnp.float32)                               # (in, hidden)
        b0_p = b0.astype(jnp.float32).reshape(1, hidden)            # (1, hidden)
        w1_p = jnp.pad(w1.astype(jnp.float32),
                       ((0, 0), (0, out_pad - out_dim)))            # (hidden, out_pad)
        b1_p = jnp.pad(b1.astype(jnp.float32).reshape(1, out_dim),
                       ((0, 0), (0, out_pad - out_dim)))            # (1, out_pad)

        out_p = pl.pallas_call(
            functools.partial(_two_layer_kernel, act0=act0, act1=act1),
            out_shape=jax.ShapeDtypeStruct((b_padded, out_pad), jnp.float32),
            grid=grid,
            in_specs=[
                pl.BlockSpec((tb, in_dim), lambda i: (i, 0)),        # x: tiled over batch
                pl.BlockSpec((in_dim, hidden), lambda i: (0, 0)),    # w0: resident
                pl.BlockSpec((1, hidden), lambda i: (0, 0)),         # b0: resident
                pl.BlockSpec((hidden, out_pad), lambda i: (0, 0)),   # w1: resident
                pl.BlockSpec((1, out_pad), lambda i: (0, 0)),        # b1: resident
            ],
            out_specs=pl.BlockSpec((tb, out_pad), lambda i: (i, 0)),
            compiler_params=compiler_params,
        )(x_p, w0_p, b0_p, w1_p, b1_p)

    return out_p[:B, :out_dim]


def _torch_linear_init(key, fan_in, fan_out, bias_range):
    """Deterministic init mimicking torch: weight ~ U(-1/sqrt(fan_in), 1/sqrt(fan_in)),
    bias ~ U(bias_range[0], bias_range[1]) (DEFAULT_HYPERPARAMS biases = [0, 4])."""
    kw, kb = jax.random.split(key)
    bound = 1.0 / jnp.sqrt(jnp.float32(fan_in))
    # Stored as (in, out) so the kernel does x @ W (== torch's x @ W_t.T).
    w = jax.random.uniform(kw, (fan_in, fan_out), jnp.float32, -bound, bound)
    b = jax.random.uniform(kb, (1, fan_out), jnp.float32, bias_range[0], bias_range[1])
    return w, b


def _reference(x, w0, b0, w1, b1, activations=("linear", "abs")):
    a0 = _ACTIVATIONS[activations[0]]
    a1 = _ACTIVATIONS[activations[1]]
    return a1(a0(x @ w0 + b0) @ w1 + b1)


if __name__ == "__main__":
    # Small shapes consistent with the module: batch=2, input_size=8, hidden=20, output_size=4
    batch, input_size, hidden, output_size = 2, 8, 20, 4

    key = jax.random.PRNGKey(0)
    kx, k0, k1, kx2 = jax.random.split(key, 4)

    x = jax.random.normal(kx, (batch, input_size), jnp.float32)
    w0, b0 = _torch_linear_init(k0, input_size, hidden, (0.0, 4.0))
    w1, b1 = _torch_linear_init(k1, hidden, output_size, (0.0, 4.0))

    # 1) DEFAULT_HYPERPARAMS path (layer-0 'linear', layer-1 'abs'), tiny batch -> one 8-row tile.
    out = neuralnet_forward(x, w0, b0, w1, b1)
    jax.block_until_ready(out)
    ref = _reference(x, w0, b0, w1, b1)
    assert out.shape == (batch, output_size)
    assert jnp.allclose(out, ref, atol=1e-4, rtol=1e-5)

    # 2) Batch grid + ragged padding path (multiple tiles, B not divisible by tile).
    big_batch = 300
    x2 = jax.random.normal(kx2, (big_batch, input_size), jnp.float32)
    out2 = neuralnet_forward(x2, w0, b0, w1, b1, block_batch=128)
    jax.block_until_ready(out2)
    ref2 = _reference(x2, w0, b0, w1, b1)
    assert out2.shape == (big_batch, output_size)
    assert jnp.allclose(out2, ref2, atol=1e-4, rtol=1e-5)

    # 3) General (non-identity layer-0 activation) path, e.g. an optuna trial picking 'relu'.
    out3 = neuralnet_forward(x2, w0, b0, w1, b1, block_batch=128,
                             activations=("relu", "abs"))
    jax.block_until_ready(out3)
    ref3 = _reference(x2, w0, b0, w1, b1, activations=("relu", "abs"))
    assert out3.shape == (big_batch, output_size)
    assert jnp.allclose(out3, ref3, atol=1e-4, rtol=1e-5)

    print("KERNEL_OK")
</pallas_src>

<mosaic_0001>
module attributes {stable_mosaic.version = 11 : i64} {
  func.func @_fused_linear_act_kernel(%arg0: i32, %arg1: memref<8x8xf32, #tpu.memory_space<vmem>>, %arg2: memref<8x128xf32, #tpu.memory_space<vmem>>, %arg3: memref<1x128xf32, #tpu.memory_space<vmem>>, %arg4: memref<8x128xf32, #tpu.memory_space<vmem>>) attributes {dimension_semantics = [#tpu.dimension_semantics<parallel>], iteration_bounds = array<i64: 1>, scalar_prefetch = 0 : i64, scratch_operands = 0 : i64, tpu.core_type = #tpu.core_type<tc>, window_params = [{transform_indices = @transform_0, window_bounds = array<i64: 8, 8>}, {pipeline_mode = #tpu.pipeline_mode<synchronous>, transform_indices = @transform_1, window_bounds = array<i64: 8, 128>}, {pipeline_mode = #tpu.pipeline_mode<synchronous>, transform_indices = @transform_2, window_bounds = array<i64: 1, 128>}, {transform_indices = @transform_3, window_bounds = array<i64: 8, 128>}]} {
    %c0 = arith.constant 0 : index
    %c0_0 = arith.constant 0 : index
    %0 = vector.load %arg1[%c0, %c0_0] : memref<8x8xf32, #tpu.memory_space<vmem>>, vector<8x8xf32>
    %c0_1 = arith.constant 0 : index
    %c0_2 = arith.constant 0 : index
    %1 = vector.load %arg2[%c0_1, %c0_2] : memref<8x128xf32, #tpu.memory_space<vmem>>, vector<8x128xf32>
    %cst = arith.constant dense<0.000000e+00> : vector<8x128xf32>
    %2 = tpu.matmul %0, %1, %cst {dimension_numbers = #tpu.dot_dimension_numbers<[1], [0], [0], [1], [0, 0, 1, 1], [], []>} : vector<8x8xf32>, vector<8x128xf32>, vector<8x128xf32> -> vector<8x128xf32>
    %c0_3 = arith.constant 0 : index
    %c0_4 = arith.constant 0 : index
    %3 = vector.load %arg3[%c0_3, %c0_4] : memref<1x128xf32, #tpu.memory_space<vmem>>, vector<1x128xf32>
    %4 = vector.broadcast %3 : vector<1x128xf32> to vector<8x128xf32>
    %5 = arith.addf %2, %4 : vector<8x128xf32>
    %6 = math.absf %5 : vector<8x128xf32>
    %c0_5 = arith.constant 0 : index
    %c0_6 = arith.constant 0 : index
    %7 = vector.load %arg4[%c0_5, %c0_6] : memref<8x128xf32, #tpu.memory_space<vmem>>, vector<8x128xf32>
    tpu.vector_store %arg4[%c0_5, %c0_6], %6 {strides = array<i32>} : memref<8x128xf32, #tpu.memory_space<vmem>>, vector<8x128xf32>,
    return
  }
  func.func @transform_0(%arg0: i32) -> (i32, i32) {
    %c0_i32 = arith.constant 0 : i32
    %c0_i32_0 = arith.constant 0 : i32
    return %arg0, %c0_i32 : i32, i32
  }
  func.func @transform_1(%arg0: i32) -> (i32, i32) {
    %c0_i32 = arith.constant 0 : i32
    %c0_i32_0 = arith.constant 0 : i32
    %c0_i32_1 = arith.constant 0 : i32
    return %c0_i32, %c0_i32_0 : i32, i32
  }
  func.func @transform_2(%arg0: i32) -> (i32, i32) {
    %c0_i32 = arith.constant 0 : i32
    %c0_i32_0 = arith.constant 0 : i32
    %c0_i32_1 = arith.constant 0 : i32
    return %c0_i32, %c0_i32_0 : i32, i32
  }
  func.func @transform_3(%arg0: i32) -> (i32, i32) {
    %c0_i32 = arith.constant 0 : i32
    %c0_i32_0 = arith.constant 0 : i32
    return %arg0, %c0_i32 : i32, i32
  }
}

</mosaic_0001>

<bundles_post_ra>
// kernel: tpu_custom_call.1
= control target key start
LH: loop header
LB: loop body
LE: loop exit
PB: predicated region body
PF: predicated region fallthrough
CT: control target
= control target key end

     0   :  { %8 = vsyncpa [#allocation3], 0  ;;  %s290_s0 = inlined_call_operand.hbm [shape: f32[8,8], index: 0, kind: input, shape index: {}]   ;;  %s291_s1 = inlined_call_operand.hbm [shape: f32[8,128], index: 1, kind: input, shape index: {}]   ;;  %s292_s2 = inlined_call_operand.vmem [shape: f32[1,128], index: 2, kind: input, shape index: {}]   ;;  %s293_s3 = inlined_call_operand.hbm [shape: f32[8,128], index: 3, kind: output, shape index: {}]  }
   0x1   :  { %9 = vsyncpa [#allocation6], 0 }
   0x2   :  { %10 = vsyncpa [#allocation4], 0  ;;  %s226_s12 = smov [#allocation2]   ;;  %s227_s14 = smov [#allocation5]  }
   0x3   :  { %s17_s13 = sshll.u32 %s226_s12, 4  ;;  %s27_s15 = sshll.u32 %s227_s14, 4  ;;  %s18_s13 = int_to_ptr.vmem [resolvable:$true] %s17_s13  ;;  %s28_s15 = int_to_ptr.vmem [resolvable:$true] %s27_s15 }
   0x4   :  { %s154_s18 = scalar_lea.hbm %s290_s0, 128 }
   0x5   :  { %p155_p0 = scmp.ne.s32.totalorder %s290_s0, %s154_s18  ;;  %p158_p1 = scmp.lt.u32.totalorder %s154_s18, %s290_s0 }
   0x7   :  { %p160_p2 = pnand %p158_p1, %p155_p0 }
   0x9   :  { %163 = shalt.err (!%p160_p2)
}
   0xa   :  { %s164_s23 = scalar_lea.vmem %s18_s13, 128  ;;  %p169_p4 = scmp.lt.s32.totalorder %s18_s13, %s18_s13 }
   0xb   :  { %p165_p3 = scmp.ne.s32.totalorder %s18_s13, %s164_s23  ;;  %p170_p5 = scmp.lt.s32.totalorder %s164_s23, %s164_s23 }
   0xd   :  { %p171_p6 = por %p170_p5, %p169_p4 }
   0xf   :  { %p172_p7 = pnand %p171_p6, %p165_p3 }
  0x11   :  { %175 = shalt.err (!%p172_p7)
}
  0x12   :  { %20 = dma.hbm_to_vmem [thread:$0]  %s290_s0, 128, %s18_s13, [#allocation3]  }
  0x13   :  { %s176_s28 = scalar_lea.hbm %s291_s1, 128 }
  0x14   :  { %p177_p8 = scmp.ne.s32.totalorder %s291_s1, %s176_s28  ;;  %p180_p9 = scmp.lt.u32.totalorder %s176_s28, %s291_s1 }
  0x16   :  { %p182_p10 = pnand %p180_p9, %p177_p8 }
  0x18   :  { %185 = shalt.err (!%p182_p10)
}
  0x19   :  { %s186_s6 = scalar_lea.vmem %s28_s15, 128  ;;  %p191_p12 = scmp.lt.s32.totalorder %s28_s15, %s28_s15 }
  0x1a   :  { %p187_p11 = scmp.ne.s32.totalorder %s28_s15, %s186_s6  ;;  %p192_p13 = scmp.lt.s32.totalorder %s186_s6, %s186_s6 }
  0x1c   :  { %p193_p0 = por %p192_p13, %p191_p12 }
  0x1e   :  { %p194_p1 = pnand %p193_p0, %p187_p11 }
  0x20   :  { %197 = shalt.err (!%p194_p1)
}
  0x21   :  { %30 = dma.hbm_to_vmem [thread:$0]  %s291_s1, 128, %s28_s15, [#allocation6]  }
  0x22   :  { %220 = dma.done.wait [#allocation3], 128  }
  0x23   :  { %221 = vsyncadd [#allocation3], 4294967168 }
  0x24   :  { %222 = dma.done.wait [#allocation6], 128  }
  0x25   :  { %223 = vsyncadd [#allocation6], 4294967168  ;;  %v228_v0 = vmov 0.0   ;;  %vm229_vm0 = vmmov 0   ;;  %vm48_vm1 = vcmask 64512   ;;  %v40_v1 = vld [vmem:[#allocation5] sm:$0xff] }
  0x26   :  { %144 = vmatprep.subr.mxu0 %v228_v0  ;;  %146 = vmatprep.mubr.msk.f32.mxu0 %vm229_vm0, %v228_v0  ;;  %v39_v2 = vld [vmem:[#allocation2] sm:$0xff]  ;;  %s230_s10 = smov [#allocation7]  }
  0x27   :  { %145 = vmatpush3.msra.mxu0 %v40_v1  ;;  %v140_v3 = vld [vmem:[%s292_s2] ss:$0 sm:$0xff]  ;;  %s130_s1 = sshll.u32 %s230_s10, 4  ;;  %s131_s1 = int_to_ptr.vmem [resolvable:$true] %s130_s1 }
  0x28   :  { %147 = vmatmul.mubr.msk.f32.vlgmr.msra.gmra.mrb[0].mxu0 %vm48_vm1, %v39_v2  ;;  %s198_s11 = scalar_lea.vmem %s131_s1, 128  ;;  %p203_p3 = scmp.lt.s32.totalorder %s131_s1, %s131_s1 }
  0x29   :  { %p199_p2 = scmp.ne.s32.totalorder %s131_s1, %s198_s11  ;;  %p204_p4 = scmp.lt.s32.totalorder %s198_s11, %s198_s11 }
  0x2b   :  { %p205_p5 = por %p204_p4, %p203_p3 }
  0x2d   :  { %p206_p6 = pnand %p205_p5, %p199_p2 }
  0xfb   :  { %v118_v4 = vpop.f32.mrb[0].mxu0 }
  0xfc   :  { %v119_v5 = vadd.f32 %v140_v3, %v118_v4  ;;  %v148_v6 = vpop.f32.mrb[1].mxu0 }
  0xfe   :  { %v122_v7 = vand.u32 2147483647, %v119_v5 }
 0x100   :  { %123 = vst [vmem:[#allocation7] sm:$0xff] %v122_v7 }
 0x101   :  { %209 = shalt.err (!%p206_p6)
}
 0x102   :  { %s210_s14 = scalar_lea.hbm %s293_s3, 128 }
 0x103   :  { %p211_p7 = scmp.ne.s32.totalorder %s293_s3, %s210_s14  ;;  %p214_p8 = scmp.lt.u32.totalorder %s210_s14, %s293_s3 }
 0x105   :  { %p216_p9 = pnand %p214_p8, %p211_p7 }
 0x107   :  { %219 = shalt.err (!%p216_p9)
}
 0x108   :  { %133 = dma.vmem_to_hbm [thread:$0]  %s131_s1, 128, %s293_s3, [#allocation4]  }
 0x109   :  { %224 = dma.done.wait [#allocation4], 128  }
 0x10a   :  { %225 = vsyncadd [#allocation4], 4294967168 }
 0x10b   :  { %137 = vsyncpa [#allocation3], 1 }
 0x10c   :  { %138 = vsyncpa [#allocation6], 1 }
 0x10d   :  { %139 = vsyncpa [#allocation4], 1 }

</bundles_post_ra>
